<compile_context>
chip_gen: v5e
topology: v5e:2x2
jax: 0.10.0
libtpu: 0.0.40
codegen_flags: <defaults>
</compile_context>

<pallas_src>
import functools

import jax
import jax.numpy as jnp
from jax import lax
from jax.experimental import pallas as pl
from jax.experimental.pallas import tpu as pltpu


def _round_up(v, m):
    return (v + m - 1) // m * m


def _vime_self_kernel(x_ref, m_ref, weT_ref, be_ref, wh_ref, bh_ref,
                      mpart_ref, xpart_ref, *, b_total, in_dim, tb, idp):
    split = pl.program_id(0)          # "parallel" axis (per-core batch half)
    step = pl.program_id(1)           # "arbitrary" reduction axis (batch tiles)
    nsteps = pl.num_programs(1)

    # Resident (8, idp) partial-sum output blocks act as the accumulators.
    @pl.when(step == 0)
    def _():
        mpart_ref[...] = jnp.zeros_like(mpart_ref)
        xpart_ref[...] = jnp.zeros_like(xpart_ref)

    x = x_ref[...].astype(jnp.float32)     # [TB, idp]
    m = m_ref[...].astype(jnp.float32)     # [TB, idp]

    # Encoder: relu(x @ We^T + be); weight already pre-transposed to [idp, hdp].
    h = jnp.maximum(
        jnp.dot(x, weT_ref[...], preferred_element_type=jnp.float32)
        + be_ref[...], 0.0)                                     # [TB, hdp]

    # Fused heads: one MXU pass for FeatureEstimator + MaskEstimator.
    z = jnp.dot(h, wh_ref[...], preferred_element_type=jnp.float32) \
        + bh_ref[...]                                           # [TB, 2*idp]
    z_x = z[:, :idp]                 # lane-aligned static split (idp % 128 == 0)
    z_m = z[:, idp:]

    x_p = jax.nn.sigmoid(z_x)                                   # [TB, idp]

    # Validity mask for zero-padded batch rows and feature columns.
    g_row0 = (split * nsteps + step) * tb
    row_ok = (lax.broadcasted_iota(jnp.int32, (tb, 1), 0) + g_row0) < b_total
    col_ok = lax.broadcasted_iota(jnp.int32, (1, idp), 1) < in_dim
    valid = jnp.logical_and(row_ok, col_ok).astype(jnp.float32) # [TB, idp]

    # Stable BCE-with-logits: softplus(z) - mask*z  (== BCE(sigmoid(z), mask)).
    bce = (jnp.maximum(z_m, 0.0) - m * z_m
           + jnp.log1p(jnp.exp(-jnp.abs(z_m)))) * valid
    mse = jnp.square(x_p - x) * valid

    # VPU-only fold into vreg-shaped (8, idp) accumulators: split the sublane
    # axis into groups of 8 (layout-free reshape) and add vreg-wise.
    mpart_ref[...] += bce.reshape(tb // 8, 8, idp).sum(axis=0)
    xpart_ref[...] += mse.reshape(tb // 8, 8, idp).sum(axis=0)


def _pick_batch_tile(b, idp, hdp, *, bytes_per_in, vmem_budget, cap=1024):
    """Largest multiple-of-8 batch tile that fits the VMEM working budget."""
    # Weights/biases: counted double-buffered (default BlockSpec pipelining),
    # conservative.  Two resident (8, idp) output blocks, double-buffered.
    weight_bytes = 2 * 4 * (idp * hdp + hdp + hdp * 2 * idp + 2 * idp)
    out_bytes = 2 * 2 * 4 * 8 * idp
    avail = max(vmem_budget - weight_bytes - out_bytes, 8 * 1024)
    # Per batch-row: x + mask double-buffered input stream, plus f32
    # temporaries (h, fused z, x_p, bce/mse partials, valid mask).
    per_row = 2 * 2 * bytes_per_in * idp + 4 * (hdp + 7 * idp)
    tb = (avail // per_row) // 8 * 8
    tb = int(max(8, min(cap, tb)))
    return min(tb, _round_up(b, 8))


def vime_self(x, mask, we, be, wfe, bfe, wme, bme, *,
              num_core_splits=2, vmem_budget=24 << 20):
    """x, mask: [B, in_dim]; weights in PyTorch [out_dim, in_dim] layout."""
    B, in_dim = x.shape
    h_dim = we.shape[0]

    # Pad feature dims to lane multiples (better MXU fill, free head split).
    idp = _round_up(in_dim, 128)
    hdp = _round_up(h_dim, 128)

    bytes_per_in = jnp.dtype(x.dtype).itemsize
    tb = _pick_batch_tile(B, idp, hdp,
                          bytes_per_in=bytes_per_in, vmem_budget=vmem_budget)

    n_tiles = -(-B // tb)
    num_splits = num_core_splits if n_tiles >= num_core_splits else 1
    steps = -(-n_tiles // num_splits)          # batch tiles per core / split
    b_pad = steps * num_splits * tb

    # --- one-time wrapper-side layout prep (pre-transpose, pad, fuse heads) ---
    xp = jnp.pad(x, ((0, b_pad - B), (0, idp - in_dim)))
    mp = jnp.pad(mask, ((0, b_pad - B), (0, idp - in_dim)))

    weT = jnp.pad(we.T, ((0, idp - in_dim), (0, hdp - h_dim)))          # [idp,hdp]
    be2 = jnp.pad(be.reshape(1, -1), ((0, 0), (0, hdp - h_dim)))        # [1,hdp]
    wfeT = jnp.pad(wfe.T, ((0, hdp - h_dim), (0, idp - in_dim)))        # [hdp,idp]
    wmeT = jnp.pad(wme.T, ((0, hdp - h_dim), (0, idp - in_dim)))        # [hdp,idp]
    wh = jnp.concatenate([wfeT, wmeT], axis=1)                          # [hdp,2*idp]
    bh = jnp.concatenate([jnp.pad(bfe, (0, idp - in_dim)),
                          jnp.pad(bme, (0, idp - in_dim))]).reshape(1, 2 * idp)

    kernel = functools.partial(_vime_self_kernel,
                               b_total=B, in_dim=in_dim, tb=tb, idp=idp)

    cost = pl.CostEstimate(
        flops=6 * b_pad * idp * hdp,
        transcendentals=3 * b_pad * idp,
        bytes_accessed=(2 * b_pad * idp * bytes_per_in
                        + 4 * (idp * hdp + hdp * 2 * idp + hdp + 2 * idp)
                        + 4 * 2 * 8 * idp * num_splits),
    )

    grid = (num_splits, steps)
    const_map = lambda c, i: (0, 0)
    xm_map = lambda c, i: (c * steps + i, 0)
    out_map = lambda c, i: (c, 0)

    m_part, x_part = pl.pallas_call(
        kernel,
        out_shape=(jax.ShapeDtypeStruct((8 * num_splits, idp), jnp.float32),
                   jax.ShapeDtypeStruct((8 * num_splits, idp), jnp.float32)),
        grid_spec=pltpu.PrefetchScalarGridSpec(
            num_scalar_prefetch=0,
            grid=grid,
            in_specs=[
                pl.BlockSpec((tb, idp), xm_map),          # x tiles (streamed)
                pl.BlockSpec((tb, idp), xm_map),          # mask tiles (streamed)
                pl.BlockSpec((idp, hdp), const_map),      # We^T   (resident)
                pl.BlockSpec((1, hdp), const_map),        # be
                pl.BlockSpec((hdp, 2 * idp), const_map),  # [Wfe^T | Wme^T]
                pl.BlockSpec((1, 2 * idp), const_map),    # [bfe | bme]
            ],
            out_specs=(pl.BlockSpec((8, idp), out_map),   # BCE partial sums
                       pl.BlockSpec((8, idp), out_map)),  # MSE partial sums
        ),
        compiler_params=pltpu.CompilerParams(
            dimension_semantics=("parallel", "arbitrary"),
            vmem_limit_bytes=48 << 20),
        cost_estimate=cost,
    )(xp, mp, weT, be2, wh, bh)

    # Tiny final reduction + mean normalization on a few KiB of partials.
    inv_n = 1.0 / float(B * in_dim)
    return jnp.sum(m_part) * inv_n, jnp.sum(x_part) * inv_n


def vime_self_ref(x, mask, we, be, wfe, bfe, wme, bme):
    h = jnp.maximum(x @ we.T + be, 0.0)
    x_p = jax.nn.sigmoid(h @ wfe.T + bfe)
    z_m = h @ wme.T + bme
    # BCE(sigmoid(z), mask) in stable logits form (== torch.nn.BCELoss except
    # when torch's log clamp at -100 would trigger).
    m_loss = jnp.mean(jnp.maximum(z_m, 0.0) - mask * z_m
                      + jnp.log1p(jnp.exp(-jnp.abs(z_m))))
    x_loss = jnp.mean(jnp.square(x_p - x))
    return m_loss, x_loss


if __name__ == "__main__":
    B, in_dim, h_dim = 8, 32, 64

    key = jax.random.PRNGKey(0)
    kx, km, k1, k2, k3, k4, k5, k6 = jax.random.split(key, 8)

    x = jax.random.normal(kx, (B, in_dim), dtype=jnp.float32)
    mask = jax.random.bernoulli(km, 0.3, (B, in_dim)).astype(jnp.float32)

    # Deterministic synthetic "Linear" params (PyTorch [out, in] layout).
    we = jax.random.normal(k1, (h_dim, in_dim), dtype=jnp.float32) * 0.1
    be = jax.random.normal(k2, (h_dim,), dtype=jnp.float32) * 0.1
    wfe = jax.random.normal(k3, (in_dim, h_dim), dtype=jnp.float32) * 0.1
    bfe = jax.random.normal(k4, (in_dim,), dtype=jnp.float32) * 0.1
    wme = jax.random.normal(k5, (in_dim, h_dim), dtype=jnp.float32) * 0.1
    bme = jax.random.normal(k6, (in_dim,), dtype=jnp.float32) * 0.1

    m_loss, x_loss = vime_self(x, mask, we, be, wfe, bfe, wme, bme)
    jax.block_until_ready((m_loss, x_loss))

    m_ref, x_ref = vime_self_ref(x, mask, we, be, wfe, bfe, wme, bme)
    assert jnp.allclose(m_loss, m_ref, atol=1e-5, rtol=1e-5), (m_loss, m_ref)
    assert jnp.allclose(x_loss, x_ref, atol=1e-5, rtol=1e-5), (x_loss, x_ref)

    print("KERNEL_OK")
</pallas_src>

<mosaic_0001>
module attributes {stable_mosaic.version = 11 : i64} {
  func.func @_vime_self_kernel(%arg0: i32, %arg1: i32, %arg2: memref<8x128xf32, #tpu.memory_space<vmem>>, %arg3: memref<8x128xf32, #tpu.memory_space<vmem>>, %arg4: memref<128x128xf32, #tpu.memory_space<vmem>>, %arg5: memref<1x128xf32, #tpu.memory_space<vmem>>, %arg6: memref<128x256xf32, #tpu.memory_space<vmem>>, %arg7: memref<1x256xf32, #tpu.memory_space<vmem>>, %arg8: memref<8x128xf32, #tpu.memory_space<vmem>>, %arg9: memref<8x128xf32, #tpu.memory_space<vmem>>) attributes {dimension_semantics = [#tpu.dimension_semantics<parallel>, #tpu.dimension_semantics<arbitrary>], iteration_bounds = array<i64: 1, 1>, scalar_prefetch = 0 : i64, scratch_operands = 0 : i64, tpu.core_type = #tpu.core_type<tc>, window_params = [{transform_indices = @transform_0, window_bounds = array<i64: 8, 128>}, {transform_indices = @transform_1, window_bounds = array<i64: 8, 128>}, {pipeline_mode = #tpu.pipeline_mode<synchronous>, transform_indices = @transform_2, window_bounds = array<i64: 128, 128>}, {pipeline_mode = #tpu.pipeline_mode<synchronous>, transform_indices = @transform_3, window_bounds = array<i64: 1, 128>}, {pipeline_mode = #tpu.pipeline_mode<synchronous>, transform_indices = @transform_4, window_bounds = array<i64: 128, 256>}, {pipeline_mode = #tpu.pipeline_mode<synchronous>, transform_indices = @transform_5, window_bounds = array<i64: 1, 256>}, {transform_indices = @transform_6, window_bounds = array<i64: 8, 128>}, {transform_indices = @transform_7, window_bounds = array<i64: 8, 128>}]} {
    %c0_i32 = arith.constant 0 : i32
    %0 = arith.cmpi eq, %arg1, %c0_i32 : i32
    %1 = arith.extui %0 : i1 to i32
    %c0_i32_0 = arith.constant 0 : i32
    %2 = arith.cmpi ne, %1, %c0_i32_0 : i32
    scf.if %2 {
      %cst_28 = arith.constant 0.000000e+00 : f32
      %64 = vector.broadcast %cst_28 : f32 to vector<8x128xf32>
      %c0_29 = arith.constant 0 : index
      %c0_30 = arith.constant 0 : index
      %65 = vector.load %arg8[%c0_29, %c0_30] : memref<8x128xf32, #tpu.memory_space<vmem>>, vector<8x128xf32>
      tpu.vector_store %arg8[%c0_29, %c0_30], %64 {strides = array<i32>} : memref<8x128xf32, #tpu.memory_space<vmem>>, vector<8x128xf32>,
      %cst_31 = arith.constant 0.000000e+00 : f32
      %66 = vector.broadcast %cst_31 : f32 to vector<8x128xf32>
      %c0_32 = arith.constant 0 : index
      %c0_33 = arith.constant 0 : index
      %67 = vector.load %arg9[%c0_32, %c0_33] : memref<8x128xf32, #tpu.memory_space<vmem>>, vector<8x128xf32>
      tpu.vector_store %arg9[%c0_32, %c0_33], %66 {strides = array<i32>} : memref<8x128xf32, #tpu.memory_space<vmem>>, vector<8x128xf32>,
    } else {
    }
    %c0 = arith.constant 0 : index
    %c0_1 = arith.constant 0 : index
    %3 = vector.load %arg2[%c0, %c0_1] : memref<8x128xf32, #tpu.memory_space<vmem>>, vector<8x128xf32>
    %c0_2 = arith.constant 0 : index
    %c0_3 = arith.constant 0 : index
    %4 = vector.load %arg3[%c0_2, %c0_3] : memref<8x128xf32, #tpu.memory_space<vmem>>, vector<8x128xf32>
    %c0_4 = arith.constant 0 : index
    %c0_5 = arith.constant 0 : index
    %5 = vector.load %arg4[%c0_4, %c0_5] : memref<128x128xf32, #tpu.memory_space<vmem>>, vector<128x128xf32>
    %cst = arith.constant dense<0.000000e+00> : vector<8x128xf32>
    %6 = tpu.matmul %3, %5, %cst {dimension_numbers = #tpu.dot_dimension_numbers<[1], [0], [0], [1], [0, 0, 1, 1], [], []>} : vector<8x128xf32>, vector<128x128xf32>, vector<8x128xf32> -> vector<8x128xf32>
    %c0_6 = arith.constant 0 : index
    %c0_7 = arith.constant 0 : index
    %7 = vector.load %arg5[%c0_6, %c0_7] : memref<1x128xf32, #tpu.memory_space<vmem>>, vector<1x128xf32>
    %8 = vector.broadcast %7 : vector<1x128xf32> to vector<8x128xf32>
    %9 = arith.addf %6, %8 : vector<8x128xf32>
    %cst_8 = arith.constant 0.000000e+00 : f32
    %10 = vector.broadcast %cst_8 : f32 to vector<8x128xf32>
    %11 = arith.maximumf %9, %10 : vector<8x128xf32>
    %c0_9 = arith.constant 0 : index
    %c0_10 = arith.constant 0 : index
    %12 = vector.load %arg6[%c0_9, %c0_10] : memref<128x256xf32, #tpu.memory_space<vmem>>, vector<128x256xf32>
    %cst_11 = arith.constant dense<0.000000e+00> : vector<8x256xf32>
    %13 = tpu.matmul %11, %12, %cst_11 {dimension_numbers = #tpu.dot_dimension_numbers<[1], [0], [0], [1], [0, 0, 1, 1], [], []>} : vector<8x128xf32>, vector<128x256xf32>, vector<8x256xf32> -> vector<8x256xf32>
    %c0_12 = arith.constant 0 : index
    %c0_13 = arith.constant 0 : index
    %14 = vector.load %arg7[%c0_12, %c0_13] : memref<1x256xf32, #tpu.memory_space<vmem>>, vector<1x256xf32>
    %15 = vector.broadcast %14 : vector<1x256xf32> to vector<8x256xf32>
    %16 = arith.addf %13, %15 : vector<8x256xf32>
    %17 = vector.extract_strided_slice %16 {offsets = [0, 0], sizes = [8, 128], strides = [1, 1]} : vector<8x256xf32> to vector<8x128xf32>
    %18 = vector.extract_strided_slice %16 {offsets = [0, 128], sizes = [8, 128], strides = [1, 1]} : vector<8x256xf32> to vector<8x128xf32>
    %19 = arith.negf %17 : vector<8x128xf32>
    %20 = math.exp %19 : vector<8x128xf32>
    %cst_14 = arith.constant 1.000000e+00 : f32
    %21 = vector.broadcast %cst_14 : f32 to vector<8x128xf32>
    %22 = arith.addf %21, %20 : vector<8x128xf32>
    %23 = arith.divf %21, %22 : vector<8x128xf32>
    %c1_i32 = arith.constant 1 : i32
    %24 = arith.muli %arg0, %c1_i32 : i32
    %25 = arith.addi %24, %arg1 : i32
    %c8_i32 = arith.constant 8 : i32
    %26 = arith.muli %25, %c8_i32 : i32
    %27 = tpu.iota {dimensions = array<i32: 0>} : vector<8x1xi32>
    %28 = vector.broadcast %26 : i32 to vector<8x1xi32>
    %29 = arith.addi %27, %28 : vector<8x1xi32>
    %c8_i32_15 = arith.constant 8 : i32
    %30 = vector.broadcast %c8_i32_15 : i32 to vector<8x1xi32>
    %31 = arith.cmpi slt, %29, %30 : vector<8x1xi32>
    %32 = tpu.iota {dimensions = array<i32: 1>} : vector<1x128xi32>
    %c32_i32 = arith.constant 32 : i32
    %33 = vector.broadcast %c32_i32 : i32 to vector<1x128xi32>
    %34 = arith.cmpi slt, %32, %33 : vector<1x128xi32>
    %35 = vector.broadcast %31 : vector<8x1xi1> to vector<8x128xi1>
    %36 = vector.broadcast %34 : vector<1x128xi1> to vector<8x128xi1>
    %37 = arith.andi %35, %36 : vector<8x128xi1>
    %38 = arith.extui %37 : vector<8x128xi1> to vector<8x128xi32>
    %39 = arith.sitofp %38 : vector<8x128xi32> to vector<8x128xf32>
    %cst_16 = arith.constant 0.000000e+00 : f32
    %40 = vector.broadcast %cst_16 : f32 to vector<8x128xf32>
    %41 = arith.maximumf %18, %40 : vector<8x128xf32>
    %42 = arith.mulf %4, %18 : vector<8x128xf32>
    %43 = arith.subf %41, %42 : vector<8x128xf32>
    %44 = math.absf %18 : vector<8x128xf32>
    %cst_17 = arith.constant 0.000000e+00 : f32
    %45 = vector.broadcast %cst_17 : f32 to vector<8x128xf32>
    %46 = arith.subf %45, %44 : vector<8x128xf32>
    %47 = math.exp %46 : vector<8x128xf32>
    %48 = math.log1p %47 : vector<8x128xf32>
    %49 = arith.addf %43, %48 : vector<8x128xf32>
    %50 = arith.mulf %49, %39 : vector<8x128xf32>
    %51 = arith.subf %23, %3 : vector<8x128xf32>
    %52 = arith.mulf %51, %51 : vector<8x128xf32>
    %53 = arith.mulf %52, %39 : vector<8x128xf32>
    %c0_18 = arith.constant 0 : index
    %c0_19 = arith.constant 0 : index
    %54 = vector.load %arg8[%c0_18, %c0_19] : memref<8x128xf32, #tpu.memory_space<vmem>>, vector<8x128xf32>
    %55 = vector.shape_cast %50 : vector<8x128xf32> to vector<1x8x128xf32>
    %cst_20 = arith.constant dense<0.000000e+00> : vector<8x128xf32>
    %56 = vector.multi_reduction <add>, %55, %cst_20 [0] : vector<1x8x128xf32> to vector<8x128xf32>
    %57 = arith.addf %54, %56 : vector<8x128xf32>
    %c0_21 = arith.constant 0 : index
    %c0_22 = arith.constant 0 : index
    %58 = vector.load %arg8[%c0_21, %c0_22] : memref<8x128xf32, #tpu.memory_space<vmem>>, vector<8x128xf32>
    tpu.vector_store %arg8[%c0_21, %c0_22], %57 {strides = array<i32>} : memref<8x128xf32, #tpu.memory_space<vmem>>, vector<8x128xf32>,
    %c0_23 = arith.constant 0 : index
    %c0_24 = arith.constant 0 : index
    %59 = vector.load %arg9[%c0_23, %c0_24] : memref<8x128xf32, #tpu.memory_space<vmem>>, vector<8x128xf32>
    %60 = vector.shape_cast %53 : vector<8x128xf32> to vector<1x8x128xf32>
    %cst_25 = arith.constant dense<0.000000e+00> : vector<8x128xf32>
    %61 = vector.multi_reduction <add>, %60, %cst_25 [0] : vector<1x8x128xf32> to vector<8x128xf32>
    %62 = arith.addf %59, %61 : vector<8x128xf32>
    %c0_26 = arith.constant 0 : index
    %c0_27 = arith.constant 0 : index
    %63 = vector.load %arg9[%c0_26, %c0_27] : memref<8x128xf32, #tpu.memory_space<vmem>>, vector<8x128xf32>
    tpu.vector_store %arg9[%c0_26, %c0_27], %62 {strides = array<i32>} : memref<8x128xf32, #tpu.memory_space<vmem>>, vector<8x128xf32>,
    return
  }
  func.func @transform_0(%arg0: i32, %arg1: i32) -> (i32, i32) {
    %c1_i32 = arith.constant 1 : i32
    %0 = arith.muli %arg0, %c1_i32 : i32
    %1 = arith.addi %0, %arg1 : i32
    %c0_i32 = arith.constant 0 : i32
    %c0_i32_0 = arith.constant 0 : i32
    return %1, %c0_i32 : i32, i32
  }
  func.func @transform_1(%arg0: i32, %arg1: i32) -> (i32, i32) {
    %c1_i32 = arith.constant 1 : i32
    %0 = arith.muli %arg0, %c1_i32 : i32
    %1 = arith.addi %0, %arg1 : i32
    %c0_i32 = arith.constant 0 : i32
    %c0_i32_0 = arith.constant 0 : i32
    return %1, %c0_i32 : i32, i32
  }
  func.func @transform_2(%arg0: i32, %arg1: i32) -> (i32, i32) {
    %c0_i32 = arith.constant 0 : i32
    %c0_i32_0 = arith.constant 0 : i32
    %c0_i32_1 = arith.constant 0 : i32
    return %c0_i32, %c0_i32_0 : i32, i32
  }
  func.func @transform_3(%arg0: i32, %arg1: i32) -> (i32, i32) {
    %c0_i32 = arith.constant 0 : i32
    %c0_i32_0 = arith.constant 0 : i32
    %c0_i32_1 = arith.constant 0 : i32
    return %c0_i32, %c0_i32_0 : i32, i32
  }
  func.func @transform_4(%arg0: i32, %arg1: i32) -> (i32, i32) {
    %c0_i32 = arith.constant 0 : i32
    %c0_i32_0 = arith.constant 0 : i32
    %c0_i32_1 = arith.constant 0 : i32
    return %c0_i32, %c0_i32_0 : i32, i32
  }
  func.func @transform_5(%arg0: i32, %arg1: i32) -> (i32, i32) {
    %c0_i32 = arith.constant 0 : i32
    %c0_i32_0 = arith.constant 0 : i32
    %c0_i32_1 = arith.constant 0 : i32
    return %c0_i32, %c0_i32_0 : i32, i32
  }
  func.func @transform_6(%arg0: i32, %arg1: i32) -> (i32, i32) {
    %c0_i32 = arith.constant 0 : i32
    %c0_i32_0 = arith.constant 0 : i32
    return %arg0, %c0_i32 : i32, i32
  }
  func.func @transform_7(%arg0: i32, %arg1: i32) -> (i32, i32) {
    %c0_i32 = arith.constant 0 : i32
    %c0_i32_0 = arith.constant 0 : i32
    return %arg0, %c0_i32 : i32, i32
  }
}

</mosaic_0001>

<bundles_post_ra>
// kernel: tpu_custom_call.1
= control target key start
LH: loop header
LB: loop body
LE: loop exit
PB: predicated region body
PF: predicated region fallthrough
CT: control target
= control target key end

     0   :  { %13 = vsyncpa [#allocation3], 0  ;;  %s576_s0 = inlined_call_operand.hbm [shape: f32[8,128], index: 0, kind: input, shape index: {}]   ;;  %s577_s1 = inlined_call_operand.hbm [shape: f32[8,128], index: 1, kind: input, shape index: {}]   ;;  %s578_s2 = inlined_call_operand.hbm [shape: f32[128,128], index: 2, kind: input, shape index: {}]   ;;  %s579_s3 = inlined_call_operand.vmem [shape: f32[1,128], index: 3, kind: input, shape index: {}]   ;;  %s580_s4 = inlined_call_operand.hbm [shape: f32[128,256], index: 4, kind: input, shape index: {}]   ;;  %s581_s5 = inlined_call_operand.vmem [shape: f32[1,256], index: 5, kind: input, shape index: {}]   ;;  %s582_s6 = inlined_call_operand.hbm [shape: f32[8,128], index: 6, kind: output, shape index: {0}]   ;;  %s583_s7 = inlined_call_operand.hbm [shape: f32[8,128], index: 7, kind: output, shape index: {1}]  }
   0x1   :  { %14 = vsyncpa [#allocation6], 0 }
   0x2   :  { %15 = vsyncpa [#allocation9], 0 }
   0x3   :  { %16 = vsyncpa [#allocation4], 0  ;;  %s40_s26 = sshll.u32 %s577_s1, 4  ;;  %s41_s26 = int_to_ptr.hbm [resolvable:$true] %s40_s26 }
   0x4   :  { %17 = vsyncpa [#allocation12], 0  ;;  %s497_s27 = smov [#allocation5]   ;;  %s26_s8 = sshll.u32 %s576_s0, 4  ;;  %s27_s8 = int_to_ptr.hbm [resolvable:$true] %s26_s8 }
   0x5   :  { %s42_s28 = sshll.u32 %s497_s27, 4  ;;  %s498_s9 = smov [#allocation2]   ;;  %s43_s28 = int_to_ptr.vmem [resolvable:$true] %s42_s28 }
   0x6   :  { %45 = dma.hbm_to_vmem [thread:$0]  %s41_s26, 128, %s43_s28, [#allocation6]  }
   0x7   :  { %s28_s10 = sshll.u32 %s498_s9, 4  ;;  %s50_s13 = sshll.u32 %s578_s2, 4  ;;  %s29_s10 = int_to_ptr.vmem [resolvable:$true] %s28_s10  ;;  %s51_s13 = int_to_ptr.hbm [resolvable:$true] %s50_s13 }
   0x8   :  { %31 = dma.hbm_to_vmem [thread:$0]  %s27_s8, 128, %s29_s10, [#allocation3]  }
   0x9   :  { %s499_s1 = smov [#allocation7]   ;;  %s65_s17 = sshll.u32 %s580_s4, 4  ;;  %s66_s17 = int_to_ptr.hbm [resolvable:$true] %s65_s17 }
   0xa   :  { %s52_s14 = sshll.u32 %s499_s1, 4  ;;  %s500_s18 = smov 128   ;;  %s53_s14 = int_to_ptr.vmem [resolvable:$true] %s52_s14 }
   0xb   :  { %s501_s0 = smov 8   ;;  %s502_s19 = smov [#allocation8]  }
   0xc   :  { %58 = dma.hbm_to_vmem [thread:$0]  %s51_s13, 2048, %s53_s14, [#allocation6], %s500_s18, %s500_s18, %s501_s0  }
   0xd   :  { %s67_s20 = sshll.u32 %s502_s19, 4  ;;  %s503_s21 = smov 256   ;;  %s68_s20 = int_to_ptr.vmem [resolvable:$true] %s67_s20 }
   0xe   :  { %s504_s22 = smov 16  }
   0xf   :  { %73 = dma.hbm_to_vmem [thread:$0]  %s66_s17, 4096, %s68_s20, [#allocation9], %s503_s21, %s503_s21, %s504_s22  }
  0x10   :  { %487 = dma.done.wait [#allocation3], 128  }
  0x11   :  { %488 = vsyncadd [#allocation3], 4294967168 }
  0x12   :  { %489 = dma.done.wait [#allocation6], 2176  }
  0x13   :  { %490 = vsyncadd [#allocation6], 4294965120 }
  0x14   :  { %491 = dma.done.wait [#allocation9], 4096  }
  0x15   :  { %492 = vsyncadd [#allocation9], 4294963200  ;;  %v117_v0 = vld [vmem:[#allocation7 + $0x78] sm:$0xff]  ;;  %v116_v1 = vld [vmem:[#allocation7 + $0x70] sm:$0xff]  ;;  %s304_s27 = sshll.u32 %s583_s7, 4  ;;  %s507_s28 = smov [#allocation10]   ;;  %s305_s27 = int_to_ptr.hbm [resolvable:$true] %s304_s27 }
  0x16   :  { %122 = vmatpush.msra.mxu0 %v117_v0  ;;  %v115_v2 = vld [vmem:[#allocation7 + $0x68] sm:$0xff]  ;;  %v114_v3 = vld [vmem:[#allocation7 + $0x60] sm:$0xff]  ;;  %v113_v4 = vld [vmem:[#allocation7 + $0x58] sm:$0xff]  ;;  %s291_s29 = sshll.u32 %s507_s28, 4  ;;  %s293_s9 = sshll.u32 %s582_s6, 4  ;;  %s292_s29 = int_to_ptr.vmem [resolvable:$true] %s291_s29  ;;  %s294_s9 = int_to_ptr.hbm [resolvable:$true] %s293_s9 }
  0x17   :  { %v173_v5 = vld [vmem:[#allocation8 + $0xf0] sm:$0xff]  ;;  %v174_v6 = vld [vmem:[#allocation8 + $0xf8] sm:$0xff]  ;;  %v171_v7 = vld [vmem:[#allocation8 + $0xe0] sm:$0xff] }
  0x18   :  { %123 = vmatpush.msra.mxu0 %v116_v1  ;;  %181 = vmatpush.msra.mxu1 %v173_v5  ;;  %v172_v8 = vld [vmem:[#allocation8 + $0xe8] sm:$0xff]  ;;  %v169_v9 = vld [vmem:[#allocation8 + $0xd0] sm:$0xff]  ;;  %v170_v11 = vld [vmem:[#allocation8 + $0xd8] sm:$0xff]  ;;  %v247_v5 = vlaneseq }
  0x19   :  { %201 = vmatpush.msra.mxu2 %v174_v6  ;;  %v112_v10 = vld [vmem:[#allocation7 + $0x50] sm:$0xff]  ;;  %v167_v12 = vld [vmem:[#allocation8 + $0xc0] sm:$0xff]  ;;  %v111_v13 = vld [vmem:[#allocation7 + $0x48] sm:$0xff] }
  0x1a   :  { %124 = vmatpush.msra.mxu0 %v115_v2  ;;  %182 = vmatpush.msra.mxu1 %v171_v7  ;;  %v168_v14 = vld [vmem:[#allocation8 + $0xc8] sm:$0xff]  ;;  %v165_v15 = vld [vmem:[#allocation8 + $0xb0] sm:$0xff]  ;;  %v110_v16 = vld [vmem:[#allocation7 + $0x40] sm:$0xff] }
  0x1b   :  { %202 = vmatpush.msra.mxu2 %v172_v8  ;;  %v166_v17 = vld [vmem:[#allocation8 + $0xb8] sm:$0xff]  ;;  %v163_v18 = vld [vmem:[#allocation8 + $0xa0] sm:$0xff]  ;;  %v164_v20 = vld [vmem:[#allocation8 + $0xa8] sm:$0xff] }
  0x1c   :  { %125 = vmatpush.msra.mxu0 %v114_v3  ;;  %183 = vmatpush.msra.mxu1 %v169_v9  ;;  %v109_v19 = vld [vmem:[#allocation7 + $0x38] sm:$0xff]  ;;  %v161_v21 = vld [vmem:[#allocation8 + $0x90] sm:$0xff]  ;;  %v159_v24 = vld [vmem:[#allocation8 + $0x80] sm:$0xff] }
  0x1d   :  { %203 = vmatpush.msra.mxu2 %v170_v11  ;;  %v108_v22 = vld [vmem:[#allocation7 + $0x30] sm:$0xff]  ;;  %v162_v23 = vld [vmem:[#allocation8 + $0x98] sm:$0xff]  ;;  %v107_v25 = vld [vmem:[#allocation7 + $0x28] sm:$0xff] }
  0x1e   :  { %126 = vmatpush.msra.mxu0 %v113_v4  ;;  %184 = vmatpush.msra.mxu1 %v167_v12  ;;  %v160_v26 = vld [vmem:[#allocation8 + $0x88] sm:$0xff]  ;;  %v157_v27 = vld [vmem:[#allocation8 + $0x70] sm:$0xff]  ;;  %v106_v28 = vld [vmem:[#allocation7 + $0x20] sm:$0xff] }
  0x1f   :  { %204 = vmatpush.msra.mxu2 %v168_v14  ;;  %v158_v29 = vld [vmem:[#allocation8 + $0x78] sm:$0xff]  ;;  %v155_v30 = vld [vmem:[#allocation8 + $0x60] sm:$0xff]  ;;  %v156_v32 = vld [vmem:[#allocation8 + $0x68] sm:$0xff] }
  0x20   :  { %127 = vmatpush.msra.mxu0 %v112_v10  ;;  %185 = vmatpush.msra.mxu1 %v165_v15  ;;  %v105_v31 = vld [vmem:[#allocation7 + $0x18] sm:$0xff]  ;;  %v153_v33 = vld [vmem:[#allocation8 + $0x50] sm:$0xff]  ;;  %v151_v36 = vld [vmem:[#allocation8 + $0x40] sm:$0xff] }
  0x21   :  { %205 = vmatpush.msra.mxu2 %v166_v17  ;;  %v104_v34 = vld [vmem:[#allocation7 + $0x10] sm:$0xff]  ;;  %v154_v35 = vld [vmem:[#allocation8 + $0x58] sm:$0xff]  ;;  %v103_v37 = vld [vmem:[#allocation7 + $0x8] sm:$0xff] }
  0x22   :  { %128 = vmatpush.msra.mxu0 %v111_v13  ;;  %186 = vmatpush.msra.mxu1 %v163_v18  ;;  %v152_v38 = vld [vmem:[#allocation8 + $0x48] sm:$0xff]  ;;  %v149_v39 = vld [vmem:[#allocation8 + $0x30] sm:$0xff]  ;;  %v102_v40 = vld [vmem:[#allocation7] sm:$0xff]  ;;  %v248_v13 = vand.u32 127, %v247_v5 }
  0x23   :  { %206 = vmatpush.msra.mxu2 %v164_v20  ;;  %v150_v41 = vld [vmem:[#allocation8 + $0x38] sm:$0xff]  ;;  %v560_v42 = vld [vmem:[#allocation2] sm:$0xff]  ;;  %v147_v43 = vld [vmem:[#allocation8 + $0x20] sm:$0xff] }
  0x24   :  { %129 = vmatpush.msra.mxu0 %v110_v16  ;;  %187 = vmatpush.msra.mxu1 %v161_v21  ;;  %v148_v44 = vld [vmem:[#allocation8 + $0x28] sm:$0xff]  ;;  %v145_v45 = vld [vmem:[#allocation8 + $0x10] sm:$0xff]  ;;  %v146_v46 = vld [vmem:[#allocation8 + $0x18] sm:$0xff]  ;;  %vm249_vm3 = vcmp.lt.s32.totalorder %v248_v13, 32 }
  0x25   :  { %207 = vmatpush.msra.mxu2 %v162_v23  ;;  %v143_v47 = vld [vmem:[#allocation8] sm:$0xff]  ;;  %v144_v48 = vld [vmem:[#allocation8 + $0x8] sm:$0xff]  ;;  %v334_v49 = vld [vmem:[%s579_s3] ss:$0 sm:$0xff]  ;;  %s506_s3 = smov [#allocation11]  }
  0x26   :  { %130 = vmatpush.msra.mxu0 %v109_v19  ;;  %188 = vmatpush.msra.mxu1 %v159_v24  ;;  %v175_v53 = vld [vmem:[%s581_s5] sm:$0x3]  ;;  %v101_v12 = vld [vmem:[#allocation5] sm:$0xff]  ;;  %s302_s5 = sshll.u32 %s506_s3, 4  ;;  %s303_s5 = int_to_ptr.vmem [resolvable:$true] %s302_s5 }
  0x27   :  { %208 = vmatpush.msra.mxu2 %v160_v26  ;;  %v177_v54 = vperm.slane %v175_v53, 0  ;;  %v178_v58 = vperm.slane %v175_v53, 1 }
  0x28   :  { %131 = vmatpush.msra.mxu0 %v108_v22  ;;  %189 = vmatpush.msra.mxu1 %v157_v27  ;;  %v505_v27 = vmov 0.0  }
  0x29   :  { %209 = vmatpush.msra.mxu2 %v158_v29 }
  0x2a   :  { %132 = vmatpush.msra.mxu0 %v107_v25  ;;  %190 = vmatpush.msra.mxu1 %v155_v30 }
  0x2b   :  { %210 = vmatpush.msra.mxu2 %v156_v32 }
  0x2c   :  { %133 = vmatpush.msra.mxu0 %v106_v28  ;;  %191 = vmatpush.msra.mxu1 %v153_v33  ;;  %v322_v28 = vsel %vm249_vm3, 1.0, %v505_v27 }
  0x2d   :  { %211 = vmatpush.msra.mxu2 %v154_v35 }
  0x2e   :  { %134 = vmatpush.msra.mxu0 %v105_v31  ;;  %192 = vmatpush.msra.mxu1 %v151_v36 }
  0x2f   :  { %212 = vmatpush.msra.mxu2 %v152_v38 }
  0x30   :  { %135 = vmatpush.msra.mxu0 %v104_v34  ;;  %193 = vmatpush.msra.mxu1 %v149_v39 }
  0x31   :  { %213 = vmatpush.msra.mxu2 %v150_v41 }
  0x32   :  { %136 = vmatpush.msra.mxu0 %v103_v37  ;;  %194 = vmatpush.msra.mxu1 %v147_v43 }
  0x33   :  { %214 = vmatpush.msra.mxu2 %v148_v44 }
  0x34   :  { %137 = vmatpush.msra.mxu0 %v102_v40  ;;  %195 = vmatpush.msra.mxu1 %v145_v45 }
  0x35   :  { %138 = vmatmul.f32.vlgmr.msra.gmra.mxu0 %v560_v42  ;;  %215 = vmatpush.msra.mxu2 %v146_v46 }
  0x36   :  { %196 = vmatpush.msra.mxu1 %v143_v47 }
  0x37   :  { %216 = vmatpush.msra.mxu2 %v144_v48 }
  0xb2   :  { %v139_v50 = vpop.f32.mrf.mxu0 }
  0xb3   :  { %v140_v51 = vadd.f32 %v334_v49, %v139_v50 }
  0xb5   :  { %v142_v52 = vmax.f32 %v140_v51, 0.0 }
  0xb7   :  { %197 = vmatmul.f32.vlgmr.msra.gmra.mxu1 %v142_v52  ;;  %217 = vmatmul.f32.vlgmr.msra.gmra.mxu2 %v142_v52 }
 0x134   :  { %v198_v55 = vpop.f32.mrf.mxu1 }
 0x135   :  { %v199_v56 = vadd.f32 %v198_v55, %v177_v54 }
 0x137   :  { %v321_v57 = vmul.f32 -1.442695, %v199_v56 }
 0x139   :  { %335 = vpow2.f32 %v321_v57 }
 0x13a   :  { %v218_v59 = vpop.f32.mrf.mxu2 }
 0x13b   :  { %v219_v60 = vadd.f32 %v218_v59, %v178_v58 }
 0x13d   :  { %v260_v61 = vand.u32 2147483647, %v219_v60  ;;  %v257_v17 = vmax.f32 %v219_v60, 0.0  ;;  %v258_v18 = vmul.f32 %v219_v60, %v101_v12 }
 0x13f   :  { %v336_v62 = vpop.eup %335  ;;  %v261_v63 = vsub.f32 0.0, %v260_v61  ;;  %v259_v26 = vsub.f32 %v257_v17, %v258_v18 }
 0x140   :  { %v224_v0 = vadd.f32 1.0, %v336_v62 }
 0x141   :  { %v262_v1 = vmul.f32 1.442695, %v261_v63 }
 0x142   :  { %337 = vrcp.f32 %v224_v0  ;;  %v236_v9 = vand.u32 2147483648, %v224_v0  ;;  %v234_v11 = vand.u32 2147483647, %v224_v0  ;;  %vm230_vm1 = vweird.f32 %v224_v0 }
 0x143   :  { %339 = vpow2.f32 %v262_v1 }
 0x144   :  { %v237_v16 = vor.u32 1.1754944e-38, %v236_v9  ;;  %vm235_vm4 = vcmp.eq.f32.partialorder %v234_v11, 8.507059e+37 }
 0x148   :  { %v338_v2 = vpop.eup %337 }
 0x149   :  { %v340_v3 = vpop.eup %339  ;;  %v226_v4 = vmul.f32 %v338_v2, %v224_v0  ;;  %vm231_vm0 = vweird.f32 %v338_v2 }
 0x14a   :  { %v264_v6 = vadd.f32 1.0, %v340_v3  ;;  %v267_v8 = vmul.f32 -0.5, %v340_v3  ;;  %vm232_vm2 = vmor %vm230_vm1, %vm231_vm0  ;;  %v270_v19 = vand.u32 2147483647, %v340_v3 }
 0x14b   :  { %v227_v7 = vsub.f32 1.0, %v226_v4 }
 0x14c   :  { %341 = vlog2.f32 %v264_v6  ;;  %v268_v15 = vadd.f32 1.0, %v267_v8  ;;  %vm271_vm5 = vcmp.lt.f32.partialorder %v270_v19, 0.0004427343 }
 0x14d   :  { %v228_v10 = vmul.f32 %v338_v2, %v227_v7 }
 0x14e   :  { %v269_v24 = vmul.f32 %v340_v3, %v268_v15 }
 0x14f   :  { %v229_v14 = vadd.f32 %v338_v2, %v228_v10 }
 0x151   :  { %v233_v20 = vsel %vm232_vm2, %v338_v2, %v229_v14 }
 0x152   :  { %v342_v21 = vpop.eup %341  ;;  %v238_v22 = vsel %vm235_vm4, %v237_v16, %v233_v20 }
 0x153   :  { %v266_v23 = vmul.f32 0.6931472, %v342_v21  ;;  %v275_v25 = vsub.f32 %v238_v22, %v560_v42 }
 0x155   :  { %v272_v29 = vsel %vm271_vm5, %v269_v24, %v266_v23  ;;  %v276_v30 = vmul.f32 %v275_v25, %v275_v25 }
 0x156   :  { %v273_v31 = vadd.f32 %v272_v29, %v259_v26 }
 0x157   :  { %v277_v32 = vmul.f32 %v322_v28, %v276_v30 }
 0x158   :  { %v274_v33 = vmul.f32 %v322_v28, %v273_v31 }
 0x159   :  { %285 = vst [vmem:[#allocation11] sm:$0xff] %v277_v32 }
 0x15a   :  { %281 = vst [vmem:[#allocation10] sm:$0xff] %v274_v33  ;;  %307 = dma.vmem_to_hbm [thread:$0]  %s303_s5, 128, %s305_s27, [#allocation12]  }
 0x15b   :  { %296 = dma.vmem_to_hbm [thread:$0]  %s292_s29, 128, %s294_s9, [#allocation4]  }
 0x15c   :  { %493 = dma.done.wait [#allocation4], 128  }
 0x15d   :  { %494 = vsyncadd [#allocation4], 4294967168 }
 0x15e   :  { %495 = dma.done.wait [#allocation12], 128  }
 0x15f   :  { %496 = vsyncadd [#allocation12], 4294967168 }
 0x160   :  { %316 = vsyncpa [#allocation3], 1 }
 0x161   :  { %317 = vsyncpa [#allocation6], 1 }
 0x162   :  { %318 = vsyncpa [#allocation9], 1 }
 0x163   :  { %319 = vsyncpa [#allocation4], 1 }
 0x164   :  { %320 = vsyncpa [#allocation12], 1 }

</bundles_post_ra>
